<compile_context>
chip_gen: v6e
topology: v6e:2x2x1
jax: 0.10.0
libtpu: 0.0.40
codegen_flags: <defaults>
</compile_context>

<pallas_src>
import math

import jax
import jax.numpy as jnp
from jax.experimental import pallas as pl
from jax.experimental.pallas import tpu as pltpu


def _round_up(x, n):
    return (x + n - 1) // n * n


# --------------------------------------------------------------------------
# Kernels
# --------------------------------------------------------------------------

def _kernel_1k_bias(x_ref, w_ref, b_ref, o_ref):
    # Whole reduction in one block: no scratch, no accumulator RMW.
    acc = jnp.dot(x_ref[...], w_ref[...], preferred_element_type=jnp.float32)
    o_ref[...] = (acc + b_ref[...].astype(jnp.float32)).astype(o_ref.dtype)


def _kernel_1k_nobias(x_ref, w_ref, o_ref):
    o_ref[...] = jnp.dot(
        x_ref[...], w_ref[...], preferred_element_type=jnp.float32
    ).astype(o_ref.dtype)


def _kernel_kacc_bias(x_ref, w_ref, b_ref, o_ref, acc_ref):
    k = pl.program_id(2)

    @pl.when(k == 0)
    def _init():
        acc_ref[...] = jnp.zeros_like(acc_ref)

    acc_ref[...] += jnp.dot(
        x_ref[...], w_ref[...], preferred_element_type=jnp.float32
    )

    @pl.when(k == pl.num_programs(2) - 1)
    def _finalize():
        o_ref[...] = (
            acc_ref[...] + b_ref[...].astype(jnp.float32)
        ).astype(o_ref.dtype)


def _kernel_kacc_nobias(x_ref, w_ref, o_ref, acc_ref):
    k = pl.program_id(2)

    @pl.when(k == 0)
    def _init():
        acc_ref[...] = jnp.zeros_like(acc_ref)

    acc_ref[...] += jnp.dot(
        x_ref[...], w_ref[...], preferred_element_type=jnp.float32
    )

    @pl.when(k == pl.num_programs(2) - 1)
    def _finalize():
        o_ref[...] = acc_ref[...].astype(o_ref.dtype)


# --------------------------------------------------------------------------
# Wrapper
# --------------------------------------------------------------------------

def _vmem_budget_bytes():
    """~70% of physical VMEM (per-generation), with a conservative fallback."""
    try:
        cap = int(pltpu.get_tpu_info().vmem_capacity_bytes)
    except Exception:
        cap = 64 << 20  # v7x-sized fallback: safe everywhere
    return max(int(0.7 * cap), 32 << 20)


def linear_norm(x, weight, bias=None, *, tm=1024, tn=512, tk_max=2048,
                compute_dtype=None):
    """y = x @ weight + bias over the last axis of x.

    x:      (..., in_channels)
    weight: (in_channels, out_channels)   (transpose of PyTorch nn.Linear)
    bias:   (out_channels,) or None
    compute_dtype: optionally cast x/weight (e.g. jnp.bfloat16) for the native
                   MXU path; accumulation stays f32, output keeps x.dtype.
    """
    in_ch, out_ch = weight.shape
    orig_shape = x.shape
    assert orig_shape[-1] == in_ch
    out_dtype = x.dtype
    has_bias = bias is not None

    # Flatten leading dims into a single rows axis.
    m = 1
    for d in orig_shape[:-1]:
        m *= d
    x2 = x.reshape(m, in_ch)

    if compute_dtype is not None:
        # TODO(synk): cast at the producer to avoid this extra HBM pass over x.
        x2 = x2.astype(compute_dtype)
        weight = weight.astype(compute_dtype)

    # ---- N (output-channel) tiling: keep output stores lane-dense ---------
    if out_ch < 128:
        n_total = 128
        weight = jnp.pad(weight, ((0, 0), (0, n_total - out_ch)))
        if has_bias:
            bias = jnp.pad(bias, ((0, n_total - out_ch),))
    else:
        n_total = out_ch
    tn_eff = tn if n_total > tn else n_total

    # ---- K (reduction) tiling: avoid wrapper-side HBM padding -------------
    tk_max_aligned = max(tk_max - tk_max % 128, 128)
    if in_ch <= tk_max:
        tk = in_ch                     # single full-K block (fast path)
    else:
        tk = 0
        for cand in range(tk_max_aligned, 0, -128):
            if in_ch % cand == 0:      # no ragged K block, no padding
                tk = cand
                break
        if tk == 0:
            # TODO(synk): rare ragged-K fallback still pads x/W in HBM;
            # in-kernel tail-lane masking would avoid this extra pass.
            tk = tk_max_aligned
            k_pad = _round_up(in_ch, tk)
            x2 = jnp.pad(x2, ((0, 0), (0, k_pad - in_ch)))
            weight = jnp.pad(weight, ((0, k_pad - in_ch), (0, 0)))
    k_total = x2.shape[1]
    k_tiles = k_total // tk
    single_k = k_tiles == 1

    # ---- M (rows) tiling ---------------------------------------------------
    tm_eff = m if m <= tm else max(tm - tm % 8, 8)

    # ---- shrink tiles to fit the per-generation VMEM budget ----------------
    in_item = x2.dtype.itemsize
    w_item = weight.dtype.itemsize
    out_item = jnp.dtype(out_dtype).itemsize
    budget = _vmem_budget_bytes()

    def footprint(tm_, tn_):
        est = 2 * (tm_ * tk * in_item + tk * tn_ * w_item)  # dbl-buffered x, W
        if has_bias:
            est += 2 * tn_ * w_item
        est += 2 * tm_ * tn_ * out_item                      # dbl-buffered out
        if not single_k:
            est += tm_ * tn_ * 4                             # f32 accumulator
        return est

    while footprint(tm_eff, tn_eff) > budget and tm_eff > 256:
        tm_eff = max(tm_eff // 2, 256)
    while footprint(tm_eff, tn_eff) > budget and tn_eff > 256:
        tn_eff = max(tn_eff // 2, 256)
    if tm_eff != m and tm_eff % 8 != 0:
        tm_eff = max(tm_eff - tm_eff % 8, 8)
    if tn_eff != n_total and tn_eff % 128 != 0:
        tn_eff = max(tn_eff - tn_eff % 128, 128)

    m_tiles = pl.cdiv(m, tm_eff)
    n_tiles = pl.cdiv(n_total, tn_eff)

    # ---- grid ordering: shard the dominant streamed operand across TCs -----
    w_bytes = k_total * n_total * w_item
    x_bytes = m * k_total * in_item
    n_major = (n_tiles >= 2) and (w_bytes >= x_bytes)

    if n_major:
        grid = (n_tiles, m_tiles, k_tiles)
        x_map = lambda j, i, k: (i, k)
        w_map = lambda j, i, k: (k, j)
        b_map = lambda j, i, k: (0, j)
        o_map = lambda j, i, k: (i, j)
    else:
        grid = (m_tiles, n_tiles, k_tiles)
        x_map = lambda i, j, k: (i, k)
        w_map = lambda i, j, k: (k, j)
        b_map = lambda i, j, k: (0, j)
        o_map = lambda i, j, k: (i, j)

    in_specs = [
        pl.BlockSpec((tm_eff, tk), x_map),
        pl.BlockSpec((tk, tn_eff), w_map),
    ]
    operands = [x2, weight]
    if has_bias:
        in_specs.append(pl.BlockSpec((1, tn_eff), b_map))
        operands.append(bias.reshape(1, n_total))

    if single_k:
        kernel = _kernel_1k_bias if has_bias else _kernel_1k_nobias
        scratch = []
    else:
        kernel = _kernel_kacc_bias if has_bias else _kernel_kacc_nobias
        scratch = [pltpu.VMEM((tm_eff, tn_eff), jnp.float32)]

    cost = pl.CostEstimate(
        flops=2 * m * k_total * n_total,
        transcendentals=0,
        bytes_accessed=(
            x2.size * in_item
            + weight.size * w_item
            + (n_total * w_item if has_bias else 0)
            + m * n_total * out_item
        ),
    )

    vmem_limit = int(
        min(max(int(1.5 * footprint(tm_eff, tn_eff)), 16 << 20), budget)
    )

    out = pl.pallas_call(
        kernel,
        out_shape=jax.ShapeDtypeStruct((m, n_total), out_dtype),
        grid_spec=pltpu.PrefetchScalarGridSpec(
            num_scalar_prefetch=0,
            grid=grid,
            in_specs=in_specs,
            out_specs=pl.BlockSpec((tm_eff, tn_eff), o_map),
            scratch_shapes=scratch,
        ),
        compiler_params=pltpu.CompilerParams(
            dimension_semantics=("parallel", "parallel", "arbitrary"),
            vmem_limit_bytes=vmem_limit,
        ),
        cost_estimate=cost,
    )(*operands)

    if n_total != out_ch:
        out = out[:, :out_ch]
    return out.reshape(*orig_shape[:-1], out_ch)


def init_linear_params(key, in_channels, out_channels, dtype=jnp.float32):
    """Deterministic init matching nn.Linear's default (uniform +/-1/sqrt(in))."""
    kw, kb = jax.random.split(key)
    bound = 1.0 / math.sqrt(in_channels)
    # Stored as (in, out) = transpose of PyTorch's (out, in) layout.
    weight = jax.random.uniform(
        kw, (in_channels, out_channels), dtype=dtype, minval=-bound, maxval=bound
    )
    bias = jax.random.uniform(
        kb, (out_channels,), dtype=dtype, minval=-bound, maxval=bound
    )
    return weight, bias


if __name__ == "__main__":
    # TODO(synk): spectral_norm=True path is a training-time weight
    # reparameterization and is not implemented here (forward-only kernel).
    key = jax.random.PRNGKey(0)
    kx, kp, kx2, kp2 = jax.random.split(key, 4)

    # --- small shapes matching the module's typical use ---------------------
    batch, seq, in_channels, out_channels = 2, 8, 32, 64
    x = jax.random.normal(kx, (batch, seq, in_channels), dtype=jnp.float32)
    weight, bias = init_linear_params(kp, in_channels, out_channels)

    # 1) bias path, single-K fast path, padded-N (out_ch=64 -> 128) store.
    out = jax.block_until_ready(linear_norm(x, weight, bias))
    ref = x @ weight + bias
    assert out.shape == (batch, seq, out_channels)
    assert jnp.allclose(out, ref, atol=2e-3, rtol=2e-3)

    # 2) no-bias path.
    out_nb = jax.block_until_ready(linear_norm(x, weight, None))
    assert jnp.allclose(out_nb, x @ weight, atol=2e-3, rtol=2e-3)

    # 3) multi-K accumulator path (forced via a small tk_max).
    in2, out2 = 256, 64
    x_b = jax.random.normal(kx2, (batch, seq, in2), dtype=jnp.float32)
    w_b, b_b = init_linear_params(kp2, in2, out2)
    out_mk = jax.block_until_ready(linear_norm(x_b, w_b, b_b, tk_max=128))
    ref_mk = x_b @ w_b + b_b
    assert out_mk.shape == (batch, seq, out2)
    assert jnp.allclose(out_mk, ref_mk, atol=2e-3, rtol=2e-3)

    print("KERNEL_OK")
</pallas_src>

<mosaic_0001>
module attributes {stable_mosaic.version = 11 : i64} {
  func.func @_kernel_1k_bias(%arg0: i32, %arg1: i32, %arg2: i32, %arg3: memref<16x32xf32, #tpu.memory_space<vmem>>, %arg4: memref<32x128xf32, #tpu.memory_space<vmem>>, %arg5: memref<1x128xf32, #tpu.memory_space<vmem>>, %arg6: memref<16x128xf32, #tpu.memory_space<vmem>>) attributes {dimension_semantics = [#tpu.dimension_semantics<parallel>, #tpu.dimension_semantics<parallel>, #tpu.dimension_semantics<arbitrary>], iteration_bounds = array<i64: 1, 1, 1>, scalar_prefetch = 0 : i64, scratch_operands = 0 : i64, tpu.core_type = #tpu.core_type<tc>, window_params = [{transform_indices = @transform_0, window_bounds = array<i64: 16, 32>}, {transform_indices = @transform_1, window_bounds = array<i64: 32, 128>}, {transform_indices = @transform_2, window_bounds = array<i64: 1, 128>}, {transform_indices = @transform_3, window_bounds = array<i64: 16, 128>}]} {
    %c0 = arith.constant 0 : index
    %c0_0 = arith.constant 0 : index
    %0 = vector.load %arg3[%c0, %c0_0] : memref<16x32xf32, #tpu.memory_space<vmem>>, vector<16x32xf32>
    %c0_1 = arith.constant 0 : index
    %c0_2 = arith.constant 0 : index
    %1 = vector.load %arg4[%c0_1, %c0_2] : memref<32x128xf32, #tpu.memory_space<vmem>>, vector<32x128xf32>
    %cst = arith.constant dense<0.000000e+00> : vector<16x128xf32>
    %2 = tpu.matmul %0, %1, %cst {dimension_numbers = #tpu.dot_dimension_numbers<[1], [0], [0], [1], [0, 0, 1, 1], [], []>} : vector<16x32xf32>, vector<32x128xf32>, vector<16x128xf32> -> vector<16x128xf32>
    %c0_3 = arith.constant 0 : index
    %c0_4 = arith.constant 0 : index
    %3 = vector.load %arg5[%c0_3, %c0_4] : memref<1x128xf32, #tpu.memory_space<vmem>>, vector<1x128xf32>
    %4 = vector.broadcast %3 : vector<1x128xf32> to vector<16x128xf32>
    %5 = arith.addf %2, %4 : vector<16x128xf32>
    %c0_5 = arith.constant 0 : index
    %c0_6 = arith.constant 0 : index
    %6 = vector.load %arg6[%c0_5, %c0_6] : memref<16x128xf32, #tpu.memory_space<vmem>>, vector<16x128xf32>
    tpu.vector_store %arg6[%c0_5, %c0_6], %5 {strides = array<i32>} : memref<16x128xf32, #tpu.memory_space<vmem>>, vector<16x128xf32>,
    return
  }
  func.func @transform_0(%arg0: i32, %arg1: i32, %arg2: i32) -> (i32, i32) {
    %c0_i32 = arith.constant 0 : i32
    return %arg0, %arg2 : i32, i32
  }
  func.func @transform_1(%arg0: i32, %arg1: i32, %arg2: i32) -> (i32, i32) {
    %c0_i32 = arith.constant 0 : i32
    return %arg2, %arg1 : i32, i32
  }
  func.func @transform_2(%arg0: i32, %arg1: i32, %arg2: i32) -> (i32, i32) {
    %c0_i32 = arith.constant 0 : i32
    %c0_i32_0 = arith.constant 0 : i32
    return %c0_i32, %arg1 : i32, i32
  }
  func.func @transform_3(%arg0: i32, %arg1: i32, %arg2: i32) -> (i32, i32) {
    %c0_i32 = arith.constant 0 : i32
    return %arg0, %arg1 : i32, i32
  }
}

</mosaic_0001>

<bundles_post_ra>
// kernel: tpu_custom_call.1
= control target key start
LH: loop header
LB: loop body
LE: loop exit
PB: predicated region body
PF: predicated region fallthrough
CT: control target
= control target key end

     0   :  { %8 = vsyncpa [#allocation3], 0  ;;  %s297_s0 = inlined_call_operand.hbm [shape: f32[16,32], index: 0, kind: input, shape index: {}]   ;;  %s298_s1 = inlined_call_operand.hbm [shape: f32[32,128], index: 1, kind: input, shape index: {}]   ;;  %s299_s2 = inlined_call_operand.vmem [shape: f32[1,128], index: 2, kind: input, shape index: {}]   ;;  %s300_s3 = inlined_call_operand.hbm [shape: f32[16,128], index: 3, kind: output, shape index: {}]  }
   0x1   :  { %9 = vsyncpa [#allocation6], 0 }
   0x2   :  { %10 = vsyncpa [#allocation4], 0  ;;  %s249_s12 = smov [#allocation2]  }
   0x3   :  { %s16_s13 = sshll.u32 %s249_s12, 4  ;;  %s17_s13 = int_to_ptr.vmem [resolvable:$true] %s16_s13 }
   0x4   :  { %s191_s14 = scalar_lea.vmem %s17_s13, 256  ;;  %p196_p1 = scmp.lt.s32.totalorder %s17_s13, %s17_s13 }
   0x5   :  { %p192_p0 = scmp.ne.s32.totalorder %s17_s13, %s191_s14  ;;  %p197_p2 = scmp.lt.s32.totalorder %s191_s14, %s191_s14 }
   0x7   :  { %p198_p3 = por %p197_p2, %p196_p1 }
   0x9   :  { %p199_p4 = pnand %p198_p3, %p192_p0 }
   0xb   :  { %202 = shalt.err (!%p199_p4)
}
   0xc   :  { %s250_s15 = smov 128   ;;  %s251_s16 = smov 8  }
   0xd   :  { %22 = dma.hbm_to_vmem [thread:$0]  %s297_s0, 256, %s17_s13, [#allocation3], %s250_s15, %s250_s15, %s251_s16  }
   0xe   :  { %s252_s19 = smov [#allocation5]  }
   0xf   :  { %s28_s20 = sshll.u32 %s252_s19, 4  ;;  %s29_s20 = int_to_ptr.vmem [resolvable:$true] %s28_s20 }
  0x10   :  { %s211_s21 = scalar_lea.vmem %s29_s20, 512  ;;  %p216_p6 = scmp.lt.s32.totalorder %s29_s20, %s29_s20 }
  0x11   :  { %p212_p5 = scmp.ne.s32.totalorder %s29_s20, %s211_s21  ;;  %p217_p7 = scmp.lt.s32.totalorder %s211_s21, %s211_s21 }
  0x13   :  { %p218_p8 = por %p217_p7, %p216_p6 }
  0x15   :  { %p219_p9 = pnand %p218_p8, %p212_p5 }
  0x17   :  { %222 = shalt.err (!%p219_p9)
}
  0x18   :  { %34 = dma.hbm_to_vmem [thread:$0]  %s298_s1, 512, %s29_s20, [#allocation6], %s250_s15, %s250_s15, %s251_s16  }
  0x19   :  { %243 = dma.done.wait [#allocation3], 256  }
  0x1a   :  { %244 = vsyncadd [#allocation3], 4294967040 }
  0x1b   :  { %245 = dma.done.wait [#allocation6], 512  }
  0x1c   :  { %246 = vsyncadd [#allocation6], 4294966784  ;;  %vm56_vm0 = vcmask 261120   ;;  %v48_v0 = vld [vmem:[#allocation5 + $0x18] sm:$0xff]  ;;  %v47_v1 = vld [vmem:[#allocation5 + $0x10] sm:$0xff]  ;;  %s253_s24 = smov [#allocation7]  }
  0x1d   :  { %167 = vmatprep.subr.mxu0 %v48_v0  ;;  %v43_v2 = vld [vmem:[#allocation2] sm:$0xff]  ;;  %v46_v3 = vld [vmem:[#allocation5 + $0x8] sm:$0xff]  ;;  %v45_v4 = vld [vmem:[#allocation5] sm:$0xff]  ;;  %s145_s25 = sshll.u32 %s253_s24, 4  ;;  %s146_s25 = int_to_ptr.vmem [resolvable:$true] %s145_s25 }
  0x1e   :  { %168 = vmatpush3.msra.mxu0 %v48_v0  ;;  %175 = vmatprep.mubr.msk.f32.mxu0 %vm56_vm0, %v43_v2  ;;  %v44_v5 = vld [vmem:[#allocation2 + $0x8] sm:$0xff]  ;;  %v158_v6 = vld [vmem:[%s299_s2] ss:$0 sm:$0xff]  ;;  %s223_s26 = scalar_lea.vmem %s146_s25, 256  ;;  %p228_p11 = scmp.lt.s32.totalorder %s146_s25, %s146_s25 }
  0x1f   :  { %169 = vmatprep.subr.mxu0 %v47_v1  ;;  %p224_p10 = scmp.ne.s32.totalorder %s146_s25, %s223_s26  ;;  %p229_p12 = scmp.lt.s32.totalorder %s223_s26, %s223_s26 }
  0x20   :  { %170 = vmatpush3.msra.mxu0 %v47_v1 }
  0x21   :  { %171 = vmatprep.subr.mxu0 %v46_v3  ;;  %p230_p13 = por %p229_p12, %p228_p11 }
  0x22   :  { %172 = vmatpush3.msra.mxu0 %v46_v3 }
  0x23   :  { %173 = vmatprep.subr.mxu0 %v45_v4  ;;  %p231_p0 = pnand %p230_p13, %p224_p10 }
  0x24   :  { %174 = vmatpush3.msra.mxu0 %v45_v4 }
  0x25   :  { %176 = vmatmul.mubr.msk.f32.vlgmr.msra.gmra.mxu0 %vm56_vm0, %v44_v5 }
  0xe5   :  { %v177_v7 = vpop.f32.mrf.mxu0 }
  0xe6   :  { %v135_v8 = vadd.f32 %v177_v7, %v158_v6 }
  0xe7   :  { %v129_v9 = vpop.f32.mrf.mxu0 }
  0xe8   :  { %139 = vst [vmem:[#allocation7 + $0x8] sm:$0xff] %v135_v8  ;;  %v130_v10 = vadd.f32 %v158_v6, %v129_v9 }
  0xea   :  { %138 = vst [vmem:[#allocation7] sm:$0xff] %v130_v10 }
  0xeb   :  { %234 = shalt.err (!%p231_p0)
}
  0xec   :  { %151 = dma.vmem_to_hbm [thread:$0]  %s146_s25, 256, %s300_s3, [#allocation4], %s250_s15, %s250_s15, %s251_s16  }
  0xed   :  { %247 = dma.done.wait [#allocation4], 256  }
  0xee   :  { %248 = vsyncadd [#allocation4], 4294967040 }
  0xef   :  { %155 = vsyncpa [#allocation3], 1 }
  0xf0   :  { %156 = vsyncpa [#allocation6], 1 }
  0xf1   :  { %157 = vsyncpa [#allocation4], 1 }

</bundles_post_ra>
